<compile_context>
chip_gen: v5e
topology: v5e:2x2
jax: 0.10.0
libtpu: 0.0.40
codegen_flags: <defaults>
</compile_context>

<pallas_src>
import functools

import jax
import jax.numpy as jnp
import numpy as np
from jax import lax
from jax.experimental import pallas as pl
from jax.experimental.pallas import tpu as pltpu

EPS = 1e-5


# --------------------------------------------------------------------------- #
# Pallas kernels
# --------------------------------------------------------------------------- #

def _channel_stats_kernel(x_ref, sum_ref, sq_ref):
    """Tiled per-channel sum / sum-of-squares with an accumulator output."""
    @pl.when(pl.program_id(0) == 0)
    def _():
        sum_ref[...] = jnp.zeros_like(sum_ref)
        sq_ref[...] = jnp.zeros_like(sq_ref)

    xv = x_ref[...].astype(jnp.float32)
    sum_ref[...] += jnp.sum(xv, axis=0, keepdims=True)
    sq_ref[...] += jnp.sum(xv * xv, axis=0, keepdims=True)


def _fused_conv_kernel(*refs, dil, t_d, n_dt, d_full, has_res, has_proj,
                       emit_stats):
    """Fused BN(affine)+ReLU + dilated 3x3x3 conv (+stats / +residual).

    Inputs (in order):
      x_hbm  : (N, D, H, W, Ci) conv input, raw (pre-BN), left in HBM (ANY)
      scale  : (1, Ci) f32   BN scale  (gamma / sqrt(var+eps))
      shift  : (1, Ci) f32   BN shift  (beta - mean*scale)
      w      : (9, 3*Ci, Co) conv weights, 3 kw taps folded into K
      b      : (1, Co) f32   conv bias
      [res]  : (t_d, H, W, Cr) raw input tile for the residual branch
      [wp,bp]: (Cr, Co), (1, Co)  1x1x1 projector
    Outputs:
      out    : (t_d, H, W, Co) conv output tile (+bias, +residual if any)
      [sum,sq]: (1, 1, Co) per-tile partial sums of the conv output (for the
                *next* BatchNorm's statistics)
    Scratch:
      xraw (t_d+2d, H, W, Ci), xbn (t_d+2d, H+2d, W+2d, Ci) f32,
      slab (t_d*H*W, 3*Ci), acc (t_d*H*W, Co) f32, sem DMA((3,))
    """
    x_hbm, scale_ref, shift_ref, w_ref, b_ref = refs[:5]
    k = 5
    res_ref = wp_ref = bp_ref = None
    if has_res:
        res_ref = refs[k]
        k += 1
        if has_proj:
            wp_ref, bp_ref = refs[k], refs[k + 1]
            k += 2
    out_ref = refs[k]
    k += 1
    sum_ref = sq_ref = None
    if emit_stats:
        sum_ref, sq_ref = refs[k], refs[k + 1]
        k += 2
    xraw, xbn, slab, acc, sem = refs[k:k + 5]

    n = pl.program_id(0)
    i = pl.program_id(1)
    d = dil
    tdp = t_d + 2 * d
    Ci = xraw.shape[-1]
    H, W, Co = out_ref.shape[1], out_ref.shape[2], out_ref.shape[3]
    Hp, Wp = H + 2 * d, W + 2 * d
    M = t_d * H * W

    # ---- manual D-halo DMA from the *unpadded* HBM tensor (no jnp.pad) ---- #
    base = i * t_d
    lo_start = jnp.maximum(base - d, 0)              # clamped; only used if i>0
    hi_start = jnp.minimum(base + t_d, d_full - d)   # clamped; only used if i<last

    cp_center = pltpu.make_async_copy(
        x_hbm.at[n, pl.ds(base, t_d)], xraw.at[pl.ds(d, t_d)], sem.at[0])
    cp_lo = pltpu.make_async_copy(
        x_hbm.at[n, pl.ds(lo_start, d)], xraw.at[pl.ds(0, d)], sem.at[1])
    cp_hi = pltpu.make_async_copy(
        x_hbm.at[n, pl.ds(hi_start, d)], xraw.at[pl.ds(d + t_d, d)], sem.at[2])

    cp_center.start()

    @pl.when(i > 0)
    def _():
        cp_lo.start()

    @pl.when(i < n_dt - 1)
    def _():
        cp_hi.start()

    cp_center.wait()

    @pl.when(i > 0)
    def _():
        cp_lo.wait()

    @pl.when(i < n_dt - 1)
    def _():
        cp_hi.wait()

    # ---- fused BatchNorm affine + ReLU, zero-padded in VMEM -------------- #
    sc = scale_ref[...].astype(jnp.float32).reshape(1, 1, 1, Ci)
    sh = shift_ref[...].astype(jnp.float32).reshape(1, 1, 1, Ci)
    y = jnp.maximum(xraw[...].astype(jnp.float32) * sc + sh, 0.0)
    xbn[:, d:d + H, d:d + W, :] = y

    # H/W halo rings are always zero (padding is applied *after* BN+ReLU).
    xbn[:, 0:d, :, :] = jnp.zeros((tdp, d, Wp, Ci), xbn.dtype)
    xbn[:, d + H:Hp, :, :] = jnp.zeros((tdp, d, Wp, Ci), xbn.dtype)
    xbn[:, :, 0:d, :] = jnp.zeros((tdp, Hp, d, Ci), xbn.dtype)
    xbn[:, :, d + W:Wp, :] = jnp.zeros((tdp, Hp, d, Ci), xbn.dtype)

    # D halo slabs outside the physical volume are zero (boundary tiles).
    @pl.when(i == 0)
    def _():
        xbn[0:d, :, :, :] = jnp.zeros((d, Hp, Wp, Ci), xbn.dtype)

    @pl.when(i == n_dt - 1)
    def _():
        xbn[t_d + d:tdp, :, :, :] = jnp.zeros((d, Hp, Wp, Ci), xbn.dtype)

    # ---- 9 deep-K matmuls (3 kw taps folded into K) on the MXU ----------- #
    first = True
    for kd in range(3):
        for kh in range(3):
            for kw in range(3):
                tap = xbn[kd * d:kd * d + t_d,
                          kh * d:kh * d + H,
                          kw * d:kw * d + W, :]
                slab[:, kw * Ci:(kw + 1) * Ci] = (
                    tap.reshape(M, Ci).astype(slab.dtype))
            contrib = jnp.dot(slab[...], w_ref[3 * kd + kh],
                              preferred_element_type=jnp.float32)
            if first:
                acc[...] = contrib
                first = False
            else:
                acc[...] += contrib

    # ---- epilogue: bias, stats for the next BN, residual, store ---------- #
    a = acc[...] + b_ref[...].astype(jnp.float32)

    if emit_stats:
        sum_ref[...] = jnp.sum(a, axis=0, keepdims=True).reshape(1, 1, Co)
        sq_ref[...] = jnp.sum(a * a, axis=0, keepdims=True).reshape(1, 1, Co)

    if has_res:
        r = res_ref[...].reshape(M, res_ref.shape[-1]).astype(jnp.float32)
        if has_proj:
            r = (jnp.dot(r, wp_ref[...].astype(jnp.float32),
                         preferred_element_type=jnp.float32)
                 + bp_ref[...].astype(jnp.float32))
        a = a + r

    out_ref[...] = a.reshape(t_d, H, W, Co).astype(out_ref.dtype)


# --------------------------------------------------------------------------- #
# Helpers (tile sizing, VMEM budgets, weight layout)
# --------------------------------------------------------------------------- #

def _vmem_limit_bytes():
    try:
        info = pltpu.get_tpu_info()
        cap = getattr(info, "vmem_capacity_bytes", None)
        if cap:
            return int(cap) * 3 // 4      # ~96 MiB on v5e/v6e, ~48 MiB on v7x
    except Exception:
        pass
    return None


def _conv_step_vmem_bytes(t_d, H, W, Ci, Co, d, in_bytes, c_bytes, res_ci):
    tdp, Hp, Wp = t_d + 2 * d, H + 2 * d, W + 2 * d
    m = t_d * H * W
    v = tdp * H * W * Ci * in_bytes          # raw DMA landing buffer
    v += tdp * Hp * Wp * Ci * 4              # padded post-BN tile (f32)
    v += m * 3 * Ci * c_bytes                # im2col slab
    v += m * Co * 4                          # f32 accumulator
    v += 2 * m * Co * 4                      # double-buffered output block
    v += 2 * m * res_ci * 4                  # double-buffered residual block
    return v + (1 << 20)


def _pick_tile_d(D, H, W, Ci, Co, d, in_bytes, c_bytes, res_ci,
                 max_tile_d=None, budget=None):
    if budget is None:
        budget = 24 << 20
    divisors = [t for t in range(D, 0, -1) if D % t == 0]
    cands = [t for t in divisors if t >= min(d, D)]   # halo needs t_d >= d
    if max_tile_d is not None:
        capped = [t for t in cands if t <= max_tile_d]
        if capped:
            cands = capped
    for t in cands:                                    # largest tile that fits
        if _conv_step_vmem_bytes(t, H, W, Ci, Co, d, in_bytes, c_bytes,
                                 res_ci) <= budget:
            return t
    return cands[-1]


def _pick_stat_rows(M, H, W, cap=512):
    base = H * W
    if base <= 0 or M % base != 0:
        return M
    mult = M // base
    rows = base
    for g in range(mult, 0, -1):
        if mult % g == 0 and base * g <= cap:
            rows = base * g
            break
    if rows != M and rows % 8 != 0:
        return M
    return rows


def _prep_conv_w(w_pt, dtype):
    """(Co, Ci, 3, 3, 3) -> (9, 3*Ci, Co): taps ordered (kd, kh); K = (kw, ci)."""
    Co, Ci = int(w_pt.shape[0]), int(w_pt.shape[1])
    w = jnp.transpose(w_pt, (2, 3, 4, 1, 0)).reshape(27, Ci, Co)
    return w.reshape(9, 3 * Ci, Co).astype(dtype)


# --------------------------------------------------------------------------- #
# pallas_call wrappers
# --------------------------------------------------------------------------- #

def _channel_sums(xf, rows):
    M, C = xf.shape
    s, q = pl.pallas_call(
        _channel_stats_kernel,
        grid=(M // rows,),
        in_specs=[pl.BlockSpec((rows, C), lambda i: (i, 0))],
        out_specs=(pl.BlockSpec((1, C), lambda i: (0, 0)),
                   pl.BlockSpec((1, C), lambda i: (0, 0))),
        out_shape=(jax.ShapeDtypeStruct((1, C), jnp.float32),
                   jax.ShapeDtypeStruct((1, C), jnp.float32)),
        compiler_params=pltpu.CompilerParams(
            dimension_semantics=("arbitrary",)),
    )(xf)
    return s[0], q[0]


def _fused_conv(x_in, scale, shift, w9, bias, dil, t_d, *, out_dtype,
                compute_dtype, emit_stats=False, residual=None, wp=None,
                bp=None, vmem_limit=None):
    N, D, H, W, Ci = x_in.shape
    Co = w9.shape[-1]
    n_dt = D // t_d
    assert D % t_d == 0 and (n_dt == 1 or t_d >= dil)
    has_res = residual is not None
    has_proj = wp is not None
    tdp, Hp, Wp = t_d + 2 * dil, H + 2 * dil, W + 2 * dil
    M = t_d * H * W

    kernel = functools.partial(
        _fused_conv_kernel, dil=dil, t_d=t_d, n_dt=n_dt, d_full=D,
        has_res=has_res, has_proj=has_proj, emit_stats=emit_stats)

    in_specs = [
        pl.BlockSpec(memory_space=pl.ANY),                       # x (manual DMA)
        pl.BlockSpec((1, Ci), lambda n, i: (0, 0)),               # BN scale
        pl.BlockSpec((1, Ci), lambda n, i: (0, 0)),               # BN shift
        pl.BlockSpec((9, 3 * Ci, Co), lambda n, i: (0, 0, 0)),    # conv weights
        pl.BlockSpec((1, Co), lambda n, i: (0, 0)),               # conv bias
    ]
    args = [x_in, scale, shift, w9, bias]
    if has_res:
        Cr = residual.shape[-1]
        in_specs.append(pl.BlockSpec((None, t_d, H, W, Cr),
                                     lambda n, i: (n, i, 0, 0, 0)))
        args.append(residual)
        if has_proj:
            in_specs.append(pl.BlockSpec((Cr, Co), lambda n, i: (0, 0)))
            in_specs.append(pl.BlockSpec((1, Co), lambda n, i: (0, 0)))
            args += [wp, bp]

    out_shapes = [jax.ShapeDtypeStruct((N, D, H, W, Co), out_dtype)]
    out_specs = [pl.BlockSpec((None, t_d, H, W, Co),
                              lambda n, i: (n, i, 0, 0, 0))]
    if emit_stats:
        stats_map = lambda n, i: (n * n_dt + i, 0, 0)
        out_shapes += [jax.ShapeDtypeStruct((N * n_dt, 1, Co), jnp.float32)] * 2
        out_specs += [pl.BlockSpec((1, 1, Co), stats_map)] * 2

    scratch = [
        pltpu.VMEM((tdp, H, W, Ci), x_in.dtype),        # raw DMA landing buffer
        pltpu.VMEM((tdp, Hp, Wp, Ci), jnp.float32),     # padded post-BN tile
        pltpu.VMEM((M, 3 * Ci), compute_dtype),         # im2col slab (deep K)
        pltpu.VMEM((M, Co), jnp.float32),               # f32 accumulator
        pltpu.SemaphoreType.DMA((3,)),                  # center / lo / hi halo
    ]

    cp_kwargs = dict(dimension_semantics=("parallel", "parallel"))
    if vmem_limit is not None:
        cp_kwargs["vmem_limit_bytes"] = int(vmem_limit)

    if emit_stats:
        out_shape_arg, out_specs_arg = tuple(out_shapes), tuple(out_specs)
    else:
        out_shape_arg, out_specs_arg = out_shapes[0], out_specs[0]

    outs = pl.pallas_call(
        kernel,
        grid=(N, n_dt),
        in_specs=in_specs,
        out_specs=out_specs_arg,
        out_shape=out_shape_arg,
        scratch_shapes=scratch,
        compiler_params=pltpu.CompilerParams(**cp_kwargs),
    )(*args)
    return outs


# --------------------------------------------------------------------------- #
# Forward pass
# --------------------------------------------------------------------------- #

def residual_block_forward(x_ncdhw, params, dilation, *,
                           compute_dtype=jnp.bfloat16, max_tile_d=None):
    """Pallas implementation of _ResidualBlock.forward; input/output NCDHW."""
    x = jnp.transpose(x_ncdhw, (0, 2, 3, 4, 1)).astype(jnp.float32)   # NDHWC
    N, D, H, W, Cin = x.shape
    Cout = int(params["w1_pt"].shape[0])
    d = int(dilation)
    M = N * D * H * W

    vmem_limit = _vmem_limit_bytes()
    budget = max(int(vmem_limit * 0.4), 16 << 20) if vmem_limit else (24 << 20)
    c_bytes = jnp.dtype(compute_dtype).itemsize

    # --- BN1 statistics (tiled Pallas reduction over x) -------------------- #
    # NOTE: E[x^2]-E[x]^2 in f32; clamped at 0 (Welford left as follow-up).
    rows = _pick_stat_rows(M, H, W)
    s1, q1 = _channel_sums(x.reshape(M, Cin), rows)
    mean1 = s1 / M
    var1 = jnp.maximum(q1 / M - mean1 * mean1, 0.0)
    scale1 = (params["g1"] / jnp.sqrt(var1 + EPS)).astype(jnp.float32)
    shift1 = (params["bt1"] - mean1 * scale1).astype(jnp.float32)

    w1 = _prep_conv_w(params["w1_pt"], compute_dtype)
    w2 = _prep_conv_w(params["w2_pt"], compute_dtype)
    b1 = params["b1"].reshape(1, Cout).astype(jnp.float32)
    b2 = params["b2"].reshape(1, Cout).astype(jnp.float32)

    # --- conv1: fused BN1+ReLU + conv, emits partial BN2 stats ------------- #
    t_d1 = _pick_tile_d(D, H, W, Cin, Cout, d, 4, c_bytes, 0,
                        max_tile_d, budget)
    c1, s2p, q2p = _fused_conv(
        x, scale1.reshape(1, Cin), shift1.reshape(1, Cin), w1, b1, d, t_d1,
        out_dtype=compute_dtype, compute_dtype=compute_dtype,
        emit_stats=True, vmem_limit=vmem_limit)

    s2 = jnp.sum(s2p, axis=(0, 1))
    q2 = jnp.sum(q2p, axis=(0, 1))
    mean2 = s2 / M
    var2 = jnp.maximum(q2 / M - mean2 * mean2, 0.0)
    scale2 = (params["g2"] / jnp.sqrt(var2 + EPS)).astype(jnp.float32)
    shift2 = (params["bt2"] - mean2 * scale2).astype(jnp.float32)

    # --- conv2: fused BN2+ReLU + conv + residual (projector fused in) ------ #
    if Cin == Cout:
        wp = bp = None
    else:
        wp = jnp.transpose(params["wp_pt"].reshape(Cout, Cin),
                           (1, 0)).astype(jnp.float32)
        bp = params["bp"].reshape(1, Cout).astype(jnp.float32)

    t_d2 = _pick_tile_d(D, H, W, Cout, Cout, d, c_bytes, c_bytes, Cin,
                        max_tile_d, budget)
    out = _fused_conv(
        c1, scale2.reshape(1, Cout), shift2.reshape(1, Cout), w2, b2, d, t_d2,
        out_dtype=jnp.float32, compute_dtype=compute_dtype,
        emit_stats=False, residual=x, wp=wp, bp=bp, vmem_limit=vmem_limit)

    return jnp.transpose(out, (0, 4, 1, 2, 3))                     # -> NCDHW


# --------------------------------------------------------------------------- #
# Pure-JAX reference (for the correctness check)
# --------------------------------------------------------------------------- #

def reference_forward(x, params, dilation):
    def bn_relu(y, g, b):
        mean = y.mean(axis=(0, 2, 3, 4), keepdims=True)
        var = y.var(axis=(0, 2, 3, 4), keepdims=True)
        yn = (y - mean) / jnp.sqrt(var + EPS)
        yn = yn * g[None, :, None, None, None] + b[None, :, None, None, None]
        return jnp.maximum(yn, 0.0)

    def conv(y, w, b, dil):
        o = lax.conv_general_dilated(
            y, w, window_strides=(1, 1, 1), padding=[(dil, dil)] * 3,
            rhs_dilation=(dil, dil, dil),
            dimension_numbers=("NCDHW", "OIDHW", "NCDHW"),
            precision=lax.Precision.HIGHEST)
        return o + b[None, :, None, None, None]

    h = bn_relu(x, params["g1"], params["bt1"])
    h = conv(h, params["w1_pt"], params["b1"], dilation)
    h = bn_relu(h, params["g2"], params["bt2"])
    h = conv(h, params["w2_pt"], params["b2"], dilation)
    Cin, Cout = x.shape[1], params["w1_pt"].shape[0]
    if Cin == Cout:
        res = x
    else:
        res = lax.conv_general_dilated(
            x, params["wp_pt"], (1, 1, 1), [(0, 0)] * 3,
            dimension_numbers=("NCDHW", "OIDHW", "NCDHW"),
            precision=lax.Precision.HIGHEST)
        res = res + params["bp"][None, :, None, None, None]
    return h + res


# --------------------------------------------------------------------------- #
# main
# --------------------------------------------------------------------------- #

if __name__ == "__main__":
    # ---- test 1: projector path (Cin != Cout), bf16 compute, dilation 2 --- #
    N, Cin, Cout, S, dil = 2, 4, 8, 16, 2
    keys = jax.random.split(jax.random.PRNGKey(0), 12)
    x = jax.random.normal(keys[0], (N, Cin, S, S, S), jnp.float32)  # NCDHW
    params = dict(
        g1=1.0 + 0.1 * jax.random.normal(keys[1], (Cin,), jnp.float32),
        bt1=0.1 * jax.random.normal(keys[2], (Cin,), jnp.float32),
        g2=1.0 + 0.1 * jax.random.normal(keys[3], (Cout,), jnp.float32),
        bt2=0.1 * jax.random.normal(keys[4], (Cout,), jnp.float32),
        w1_pt=0.1 * jax.random.normal(keys[5], (Cout, Cin, 3, 3, 3), jnp.float32),
        b1=0.1 * jax.random.normal(keys[6], (Cout,), jnp.float32),
        w2_pt=0.1 * jax.random.normal(keys[7], (Cout, Cout, 3, 3, 3), jnp.float32),
        b2=0.1 * jax.random.normal(keys[8], (Cout,), jnp.float32),
        wp_pt=0.1 * jax.random.normal(keys[9], (Cout, Cin, 1, 1, 1), jnp.float32),
        bp=0.1 * jax.random.normal(keys[10], (Cout,), jnp.float32),
    )
    out = jax.block_until_ready(
        residual_block_forward(x, params, dil,
                               compute_dtype=jnp.bfloat16, max_tile_d=4))
    ref = jax.block_until_ready(reference_forward(x, params, dil))
    assert out.shape == (N, Cout, S, S, S), out.shape
    # bf16 activations/weights end-to-end (two stacked convs) -> ~1e-2 level
    # mixed-precision error vs. the f32 reference.
    np.testing.assert_allclose(np.asarray(out), np.asarray(ref),
                               rtol=5e-2, atol=5e-2)

    # ---- test 2: identity residual (Cin == Cout), f32 compute, dilation 1 - #
    C2, S2, dil2 = 8, 8, 1
    k2 = jax.random.split(jax.random.PRNGKey(1), 9)
    x2 = jax.random.normal(k2[0], (1, C2, S2, S2, S2), jnp.float32)
    params2 = dict(
        g1=1.0 + 0.1 * jax.random.normal(k2[1], (C2,), jnp.float32),
        bt1=0.1 * jax.random.normal(k2[2], (C2,), jnp.float32),
        g2=1.0 + 0.1 * jax.random.normal(k2[3], (C2,), jnp.float32),
        bt2=0.1 * jax.random.normal(k2[4], (C2,), jnp.float32),
        w1_pt=0.1 * jax.random.normal(k2[5], (C2, C2, 3, 3, 3), jnp.float32),
        b1=0.1 * jax.random.normal(k2[6], (C2,), jnp.float32),
        w2_pt=0.1 * jax.random.normal(k2[7], (C2, C2, 3, 3, 3), jnp.float32),
        b2=0.1 * jax.random.normal(k2[8], (C2,), jnp.float32),
    )
    out2 = jax.block_until_ready(
        residual_block_forward(x2, params2, dil2,
                               compute_dtype=jnp.float32, max_tile_d=2))
    ref2 = jax.block_until_ready(reference_forward(x2, params2, dil2))
    assert out2.shape == (1, C2, S2, S2, S2), out2.shape
    np.testing.assert_allclose(np.asarray(out2), np.asarray(ref2),
                               rtol=3e-2, atol=3e-2)

    print("KERNEL_OK")
</pallas_src>

<mosaic_0001>
module attributes {stable_mosaic.version = 11 : i64} {
  func.func @_channel_stats_kernel(%arg0: i32, %arg1: memref<512x4xf32, #tpu.memory_space<vmem>>, %arg2: memref<1x4xf32, #tpu.memory_space<vmem>>, %arg3: memref<1x4xf32, #tpu.memory_space<vmem>>) attributes {dimension_semantics = [#tpu.dimension_semantics<arbitrary>], iteration_bounds = array<i64: 16>, scalar_prefetch = 0 : i64, scratch_operands = 0 : i64, tpu.core_type = #tpu.core_type<tc>, window_params = [{transform_indices = @transform_0, window_bounds = array<i64: 512, 4>}, {pipeline_mode = #tpu.pipeline_mode<synchronous>, transform_indices = @transform_1, window_bounds = array<i64: 1, 4>}, {pipeline_mode = #tpu.pipeline_mode<synchronous>, transform_indices = @transform_2, window_bounds = array<i64: 1, 4>}]} {
    %c0_i32 = arith.constant 0 : i32
    %0 = arith.cmpi eq, %arg0, %c0_i32 : i32
    %1 = arith.extui %0 : i1 to i32
    %c0_i32_0 = arith.constant 0 : i32
    %2 = arith.cmpi ne, %1, %c0_i32_0 : i32
    scf.if %2 {
      %cst_11 = arith.constant 0.000000e+00 : f32
      %15 = vector.broadcast %cst_11 : f32 to vector<1x4xf32>
      %c0_12 = arith.constant 0 : index
      %c0_13 = arith.constant 0 : index
      %16 = vector.load %arg2[%c0_12, %c0_13] : memref<1x4xf32, #tpu.memory_space<vmem>>, vector<1x4xf32>
      tpu.vector_store %arg2[%c0_12, %c0_13], %15 {strides = array<i32>} : memref<1x4xf32, #tpu.memory_space<vmem>>, vector<1x4xf32>,
      %cst_14 = arith.constant 0.000000e+00 : f32
      %17 = vector.broadcast %cst_14 : f32 to vector<1x4xf32>
      %c0_15 = arith.constant 0 : index
      %c0_16 = arith.constant 0 : index
      %18 = vector.load %arg3[%c0_15, %c0_16] : memref<1x4xf32, #tpu.memory_space<vmem>>, vector<1x4xf32>
      tpu.vector_store %arg3[%c0_15, %c0_16], %17 {strides = array<i32>} : memref<1x4xf32, #tpu.memory_space<vmem>>, vector<1x4xf32>,
    } else {
    }
    %c0 = arith.constant 0 : index
    %c0_1 = arith.constant 0 : index
    %3 = vector.load %arg1[%c0, %c0_1] : memref<512x4xf32, #tpu.memory_space<vmem>>, vector<512x4xf32>
    %c0_2 = arith.constant 0 : index
    %c0_3 = arith.constant 0 : index
    %4 = vector.load %arg2[%c0_2, %c0_3] : memref<1x4xf32, #tpu.memory_space<vmem>>, vector<1x4xf32>
    %cst = arith.constant dense<0.000000e+00> : vector<4xf32>
    %5 = vector.multi_reduction <add>, %3, %cst [0] : vector<512x4xf32> to vector<4xf32>
    %6 = vector.shape_cast %5 : vector<4xf32> to vector<1x4xf32>
    %7 = arith.addf %4, %6 : vector<1x4xf32>
    %c0_4 = arith.constant 0 : index
    %c0_5 = arith.constant 0 : index
    %8 = vector.load %arg2[%c0_4, %c0_5] : memref<1x4xf32, #tpu.memory_space<vmem>>, vector<1x4xf32>
    tpu.vector_store %arg2[%c0_4, %c0_5], %7 {strides = array<i32>} : memref<1x4xf32, #tpu.memory_space<vmem>>, vector<1x4xf32>,
    %c0_6 = arith.constant 0 : index
    %c0_7 = arith.constant 0 : index
    %9 = vector.load %arg3[%c0_6, %c0_7] : memref<1x4xf32, #tpu.memory_space<vmem>>, vector<1x4xf32>
    %10 = arith.mulf %3, %3 : vector<512x4xf32>
    %cst_8 = arith.constant dense<0.000000e+00> : vector<4xf32>
    %11 = vector.multi_reduction <add>, %10, %cst_8 [0] : vector<512x4xf32> to vector<4xf32>
    %12 = vector.shape_cast %11 : vector<4xf32> to vector<1x4xf32>
    %13 = arith.addf %9, %12 : vector<1x4xf32>
    %c0_9 = arith.constant 0 : index
    %c0_10 = arith.constant 0 : index
    %14 = vector.load %arg3[%c0_9, %c0_10] : memref<1x4xf32, #tpu.memory_space<vmem>>, vector<1x4xf32>
    tpu.vector_store %arg3[%c0_9, %c0_10], %13 {strides = array<i32>} : memref<1x4xf32, #tpu.memory_space<vmem>>, vector<1x4xf32>,
    return
  }
  func.func @transform_0(%arg0: i32) -> (i32, i32) {
    %c0_i32 = arith.constant 0 : i32
    %c0_i32_0 = arith.constant 0 : i32
    return %arg0, %c0_i32 : i32, i32
  }
  func.func @transform_1(%arg0: i32) -> (i32, i32) {
    %c0_i32 = arith.constant 0 : i32
    %c0_i32_0 = arith.constant 0 : i32
    %c0_i32_1 = arith.constant 0 : i32
    return %c0_i32, %c0_i32_0 : i32, i32
  }
  func.func @transform_2(%arg0: i32) -> (i32, i32) {
    %c0_i32 = arith.constant 0 : i32
    %c0_i32_0 = arith.constant 0 : i32
    %c0_i32_1 = arith.constant 0 : i32
    return %c0_i32, %c0_i32_0 : i32, i32
  }
}

</mosaic_0001>

<bundles_post_ra>
// kernel: tpu_custom_call.1
= control target key start
LH: loop header
LB: loop body
LE: loop exit
PB: predicated region body
PF: predicated region fallthrough
CT: control target
= control target key end

     0   :  { %8 = vsyncpa [#allocation3], 0  ;;  %s971_s0 = inlined_call_operand.vmem [shape: f32[8192,4], index: 0, kind: input, shape index: {}]   ;;  %s972_s1 = inlined_call_operand.hbm [shape: f32[1,4], index: 1, kind: output, shape index: {0}]   ;;  %s973_s2 = inlined_call_operand.hbm [shape: f32[1,4], index: 2, kind: output, shape index: {1}]  }
   0x1   :  { %9 = vsyncpa [#allocation5], 0  ;;  %s738_s9 = smov 0  }
   0x2 LB: > { %s744_s10 = sadd.s32 4294967295, %s718_s9   ;;  %p615_p0 = scmp.ge.s32.totalorder %s718_s9, 1  ;;  %s718_s9 = sphi %s738_s9, %s15_s9  }
   0x3   : > { %p108_p1 = scmp.lt.s32.totalorder %s718_s9, 17 }
   0x5   : > { %p109_p2 = pnand %p615_p0, %p108_p1 }
   0x6   : > { %s616_s11 = sshll.u32 (!%p109_p2), %s744_s10, 6  ;;  %p618_p4 = scmp.ne.s32.totalorder (!%p109_p2), %s744_s10, 0 }
   0x7   : > { %112 = sbr.rel (%p109_p2) target bundleno = 172 (0xac), region = 24  ;;  %p126_p3 = scmp.lt.s32.totalorder (!%p109_p2), %s616_s11, 1023 }
   0xc   : > { %s975_s11 = smov (!%p126_p3, %s616_s11), 1023  ;;  %134 = sbr.rel (%p618_p4) target bundleno = 20 (0x14), region = 28 }
   0xd   : > { %s617_s12 = sshll.u32 %s975_s11, 3 }
   0xe   : > { %s752_s15 = scalar_lea.vmem %s971_s0, %s617_s12 }
  0x11   : > { %vm135_vm0 = vcmask 24576   ;;  %v720_v0 = vmov 0.0  }
  0x12   : > { %136 = vst.msk [vmem:[#allocation2] sm:$0x1] %vm135_vm0, %v720_v0 }
  0x13   : > { %137 = vst.msk [vmem:[#allocation4] sm:$0x1] %vm135_vm0, %v720_v0 }
  0x14 PF: > { %v138_v1 = vld [vmem:[%s752_s15] sm:$0xff]  ;;  %v139_v2 = vld [vmem:[%s752_s15 + $0x8] sm:$0xff]  ;;  %v140_v3 = vld [vmem:[%s752_s15 + $0x10] sm:$0xff]  ;;  %vm203_vm1 = vcmask 31744   ;;  %s721_s16 = smov [#allocation2]   ;;  %s548_s20 = sshll.u32 %s972_s1, 4  ;;  %s549_s20 = int_to_ptr.hbm [resolvable:$true] %s548_s20 }
  0x15   : > { %v204_v4 = vsel %vm203_vm1, %v138_v1, 0.0  ;;  %v205_v5 = vsel %vm203_vm1, %v139_v2, 0.0  ;;  %v207_v6 = vsel %vm203_vm1, %v140_v3, 0.0  ;;  %v141_v7 = vld [vmem:[%s752_s15 + $0x18] sm:$0xff]  ;;  %v142_v10 = vld [vmem:[%s752_s15 + $0x20] sm:$0xff]  ;;  %v143_v13 = vld [vmem:[%s752_s15 + $0x28] sm:$0xff]  ;;  %v341_v21 = vmul.f32 %v138_v1, %v138_v1 }
  0x16   : > { %v206_v8 = vadd.f32 %v205_v5, %v204_v4  ;;  %v209_v9 = vsel %vm203_vm1, %v141_v7, 0.0  ;;  %v211_v12 = vsel %vm203_vm1, %v142_v10, 0.0  ;;  %v213_v15 = vsel %vm203_vm1, %v143_v13, 0.0  ;;  %v144_v16 = vld [vmem:[%s752_s15 + $0x30] sm:$0xff]  ;;  %v145_v19 = vld [vmem:[%s752_s15 + $0x38] sm:$0xff]  ;;  %v146_v25 = vld [vmem:[%s752_s15 + $0x40] sm:$0xff] }
  0x17   : > { %v215_v18 = vsel %vm203_vm1, %v144_v16, 0.0  ;;  %v217_v22 = vsel %vm203_vm1, %v145_v19, 0.0  ;;  %v342_v23 = vmul.f32 %v139_v2, %v139_v2  ;;  %v343_v24 = vmul.f32 %v140_v3, %v140_v3  ;;  %v147_v29 = vld [vmem:[%s752_s15 + $0x48] sm:$0xff]  ;;  %v148_v36 = vld [vmem:[%s752_s15 + $0x50] sm:$0xff]  ;;  %v149_v42 = vld [vmem:[%s752_s15 + $0x58] sm:$0xff]  ;;  %s546_s17 = sshll.u32 %s721_s16, 4  ;;  %s547_s17 = int_to_ptr.vmem [resolvable:$true] %s546_s17 }
  0x18   : > { %v208_v11 = vadd.f32 %v207_v6, %v206_v8  ;;  %v219_v27 = vsel %vm203_vm1, %v146_v25, 0.0  ;;  %v344_v28 = vmul.f32 %v141_v7, %v141_v7  ;;  %v405_v31 = vsel %vm203_vm1, %v341_v21, 0.0  ;;  %v150_v48 = vld [vmem:[%s752_s15 + $0x60] sm:$0xff]  ;;  %v151_v54 = vld [vmem:[%s752_s15 + $0x68] sm:$0xff]  ;;  %v152_v60 = vld [vmem:[%s752_s15 + $0x70] sm:$0xff]  ;;  %p633_p5 = scmp.eq.s32.totalorder %s744_s10, 15 }
  0x19   : > { %v221_v32 = vsel %vm203_vm1, %v147_v29, 0.0  ;;  %v345_v33 = vmul.f32 %v142_v10, %v142_v10  ;;  %v406_v34 = vsel %vm203_vm1, %v342_v23, 0.0  ;;  %v408_v35 = vsel %vm203_vm1, %v343_v24, 0.0  ;;  %v153_v2 = vld [vmem:[%s752_s15 + $0x78] sm:$0xff]  ;;  %v154_v8 = vld [vmem:[%s752_s15 + $0x80] sm:$0xff]  ;;  %s722_s21 = smov [#allocation4]  }
  0x1a   : > { %v210_v14 = vadd.f32 %v209_v9, %v208_v11  ;;  %v407_v38 = vadd.f32 %v406_v34, %v405_v31  ;;  %v223_v39 = vsel %vm203_vm1, %v148_v36, 0.0  ;;  %v346_v40 = vmul.f32 %v143_v13, %v143_v13  ;;  %s558_s22 = sshll.u32 %s722_s21, 4  ;;  %s560_s25 = sshll.u32 %s973_s2, 4  ;;  %s559_s22 = int_to_ptr.vmem [resolvable:$true] %s558_s22  ;;  %s561_s25 = int_to_ptr.hbm [resolvable:$true] %s560_s25 }
  0x1b   : > { %v410_v41 = vsel %vm203_vm1, %v344_v28, 0.0  ;;  %v225_v45 = vsel %vm203_vm1, %v149_v42, 0.0  ;;  %v347_v46 = vmul.f32 %v144_v16, %v144_v16  ;;  %v412_v47 = vsel %vm203_vm1, %v345_v33, 0.0 }
  0x1c   : > { %v212_v17 = vadd.f32 %v211_v12, %v210_v14  ;;  %v409_v44 = vadd.f32 %v408_v35, %v407_v38  ;;  %v227_v51 = vsel %vm203_vm1, %v150_v48, 0.0  ;;  %v348_v52 = vmul.f32 %v145_v19, %v145_v19  ;;  %v155_v14 = vld [vmem:[%s752_s15 + $0x88] sm:$0xff] }
  0x1d   : > { %v414_v53 = vsel %vm203_vm1, %v346_v40, 0.0  ;;  %v229_v57 = vsel %vm203_vm1, %v151_v54, 0.0  ;;  %v349_v58 = vmul.f32 %v146_v25, %v146_v25  ;;  %v416_v59 = vsel %vm203_vm1, %v347_v46, 0.0  ;;  %v159_v38 = vld [vmem:[%s752_s15 + $0xa8] sm:$0xff] }
  0x1e   : > { %v214_v20 = vadd.f32 %v213_v15, %v212_v17  ;;  %v411_v50 = vadd.f32 %v410_v41, %v409_v44  ;;  %v231_v63 = vsel %vm203_vm1, %v152_v60, 0.0  ;;  %v350_v0 = vmul.f32 %v147_v29, %v147_v29  ;;  %v160_v44 = vld [vmem:[%s752_s15 + $0xb0] sm:$0xff] }
  0x1f   : > { %v418_v1 = vsel %vm203_vm1, %v348_v52, 0.0  ;;  %v233_v5 = vsel %vm203_vm1, %v153_v2, 0.0  ;;  %v351_v6 = vmul.f32 %v148_v36, %v148_v36  ;;  %v420_v7 = vsel %vm203_vm1, %v349_v58, 0.0 }
  0x20   : > { %v216_v26 = vadd.f32 %v215_v18, %v214_v20  ;;  %v413_v56 = vadd.f32 %v412_v47, %v411_v50  ;;  %v235_v11 = vsel %vm203_vm1, %v154_v8, 0.0  ;;  %v352_v12 = vmul.f32 %v149_v42, %v149_v42  ;;  %v156_v20 = vld [vmem:[%s752_s15 + $0x90] sm:$0xff]  ;;  %v161_v50 = vld [vmem:[%s752_s15 + $0xb8] sm:$0xff] }
  0x21   : > { %v422_v13 = vsel %vm203_vm1, %v350_v0, 0.0  ;;  %v237_v17 = vsel %vm203_vm1, %v155_v14, 0.0  ;;  %v353_v18 = vmul.f32 %v150_v48, %v150_v48  ;;  %v424_v19 = vsel %vm203_vm1, %v351_v6, 0.0 }
  0x22   : > { %v218_v30 = vadd.f32 %v217_v22, %v216_v26  ;;  %v415_v62 = vadd.f32 %v414_v53, %v413_v56  ;;  %v239_v23 = vsel %vm203_vm1, %v156_v20, 0.0  ;;  %v354_v24 = vmul.f32 %v151_v54, %v151_v54  ;;  %v157_v26 = vld [vmem:[%s752_s15 + $0x98] sm:$0xff]  ;;  %v162_v56 = vld [vmem:[%s752_s15 + $0xc0] sm:$0xff] }
  0x23   : > { %v426_v25 = vsel %vm203_vm1, %v352_v12, 0.0  ;;  %v241_v29 = vsel %vm203_vm1, %v157_v26, 0.0  ;;  %v428_v31 = vsel %vm203_vm1, %v353_v18, 0.0  ;;  %v356_v36 = vmul.f32 %v153_v2, %v153_v2 }
  0x24   : > { %v220_v37 = vadd.f32 %v219_v27, %v218_v30  ;;  %v417_v4 = vadd.f32 %v416_v59, %v415_v62  ;;  %v355_v30 = vmul.f32 %v152_v60, %v152_v60  ;;  %v245_v41 = vsel %vm203_vm1, %v159_v38, 0.0  ;;  %v163_v62 = vld [vmem:[%s752_s15 + $0xc8] sm:$0xff] }
  0x25   : > { %v357_v42 = vmul.f32 %v154_v8, %v154_v8  ;;  %v247_v47 = vsel %vm203_vm1, %v160_v44, 0.0  ;;  %v358_v48 = vmul.f32 %v155_v14, %v155_v14  ;;  %v249_v53 = vsel %vm203_vm1, %v161_v50, 0.0 }
  0x26   : > { %v222_v43 = vadd.f32 %v221_v32, %v220_v37  ;;  %v419_v10 = vadd.f32 %v418_v1, %v417_v4  ;;  %v158_v32 = vld [vmem:[%s752_s15 + $0xa0] sm:$0xff]  ;;  %v430_v37 = vsel %vm203_vm1, %v354_v24, 0.0  ;;  %v359_v54 = vmul.f32 %v156_v20, %v156_v20  ;;  %v164_v4 = vld [vmem:[%s752_s15 + $0xd0] sm:$0xff] }
  0x27   : > { %v243_v35 = vsel %vm203_vm1, %v158_v32, 0.0  ;;  %v251_v59 = vsel %vm203_vm1, %v162_v56, 0.0  ;;  %v360_v60 = vmul.f32 %v157_v26, %v157_v26  ;;  %v253_v1 = vsel %vm203_vm1, %v163_v62, 0.0 }
  0x28   : > { %v224_v49 = vadd.f32 %v223_v39, %v222_v43  ;;  %v421_v16 = vadd.f32 %v420_v7, %v419_v10  ;;  %v432_v43 = vsel %vm203_vm1, %v355_v30, 0.0  ;;  %v361_v2 = vmul.f32 %v158_v32, %v158_v32  ;;  %v165_v10 = vld [vmem:[%s752_s15 + $0xd8] sm:$0xff] }
  0x29   : > { %v255_v7 = vsel %vm203_vm1, %v164_v4, 0.0  ;;  %v362_v8 = vmul.f32 %v159_v38, %v159_v38  ;;  %v363_v14 = vmul.f32 %v160_v44, %v160_v44  ;;  %v364_v20 = vmul.f32 %v161_v50, %v161_v50 }
  0x2a   : > { %v226_v55 = vadd.f32 %v225_v45, %v224_v49  ;;  %v423_v22 = vadd.f32 %v422_v13, %v421_v16  ;;  %v434_v49 = vsel %vm203_vm1, %v356_v36, 0.0  ;;  %v257_v13 = vsel %vm203_vm1, %v165_v10, 0.0  ;;  %v166_v16 = vld [vmem:[%s752_s15 + $0xe0] sm:$0xff] }
  0x2b   : > { %v365_v26 = vmul.f32 %v162_v56, %v162_v56  ;;  %v366_v32 = vmul.f32 %v163_v62, %v163_v62  ;;  %v367_v38 = vmul.f32 %v164_v4, %v164_v4  ;;  %v368_v44 = vmul.f32 %v165_v10, %v165_v10 }
  0x2c   : > { %v228_v61 = vadd.f32 %v227_v51, %v226_v55  ;;  %v425_v28 = vadd.f32 %v424_v19, %v423_v22  ;;  %v436_v55 = vsel %vm203_vm1, %v357_v42, 0.0  ;;  %v259_v19 = vsel %vm203_vm1, %v166_v16, 0.0  ;;  %v167_v22 = vld [vmem:[%s752_s15 + $0xe8] sm:$0xff] }
  0x2d   : > { %v369_v50 = vmul.f32 %v166_v16, %v166_v16  ;;  %v370_v56 = vmul.f32 %v167_v22, %v167_v22  ;;  %vm338_vm2 = vcmask 24576  }
  0x2e   : > { %v230_v3 = vadd.f32 %v229_v57, %v228_v61  ;;  %v427_v34 = vadd.f32 %v426_v25, %v425_v28  ;;  %v438_v61 = vsel %vm203_vm1, %v358_v48, 0.0  ;;  %v261_v25 = vsel %vm203_vm1, %v167_v22, 0.0  ;;  %v168_v28 = vld [vmem:[%s752_s15 + $0xf0] sm:$0xff] }
  0x2f   : > { %v371_v62 = vmul.f32 %v168_v28, %v168_v28 }
  0x30   : > { %v232_v9 = vadd.f32 %v231_v63, %v230_v3  ;;  %v429_v40 = vadd.f32 %v428_v31, %v427_v34  ;;  %v440_v3 = vsel %vm203_vm1, %v359_v54, 0.0  ;;  %v263_v31 = vsel %vm203_vm1, %v168_v28, 0.0  ;;  %v169_v34 = vld [vmem:[%s752_s15 + $0xf8] sm:$0xff] }
  0x31   : > { %v372_v4 = vmul.f32 %v169_v34, %v169_v34 }
  0x32   : > { %v234_v15 = vadd.f32 %v233_v5, %v232_v9  ;;  %v431_v46 = vadd.f32 %v430_v37, %v429_v40  ;;  %v442_v9 = vsel %vm203_vm1, %v360_v60, 0.0  ;;  %v265_v37 = vsel %vm203_vm1, %v169_v34, 0.0  ;;  %v170_v40 = vld [vmem:[%s752_s15 + $0x100] sm:$0xff] }
  0x33   : > { %v373_v10 = vmul.f32 %v170_v40, %v170_v40 }
  0x34   : > { %v236_v21 = vadd.f32 %v235_v11, %v234_v15  ;;  %v433_v52 = vadd.f32 %v432_v43, %v431_v46  ;;  %v444_v15 = vsel %vm203_vm1, %v361_v2, 0.0  ;;  %v267_v43 = vsel %vm203_vm1, %v170_v40, 0.0  ;;  %v171_v46 = vld [vmem:[%s752_s15 + $0x108] sm:$0xff] }
  0x35   : > { %v374_v16 = vmul.f32 %v171_v46, %v171_v46 }
  0x36   : > { %v238_v27 = vadd.f32 %v237_v17, %v236_v21  ;;  %v435_v58 = vadd.f32 %v434_v49, %v433_v52  ;;  %v446_v21 = vsel %vm203_vm1, %v362_v8, 0.0  ;;  %v269_v49 = vsel %vm203_vm1, %v171_v46, 0.0  ;;  %v172_v52 = vld [vmem:[%s752_s15 + $0x110] sm:$0xff] }
  0x37   : > { %v375_v22 = vmul.f32 %v172_v52, %v172_v52 }
  0x38   : > { %v240_v33 = vadd.f32 %v239_v23, %v238_v27  ;;  %v437_v0 = vadd.f32 %v436_v55, %v435_v58  ;;  %v448_v27 = vsel %vm203_vm1, %v363_v14, 0.0  ;;  %v271_v55 = vsel %vm203_vm1, %v172_v52, 0.0  ;;  %v173_v58 = vld [vmem:[%s752_s15 + $0x118] sm:$0xff] }
  0x39   : > { %v376_v28 = vmul.f32 %v173_v58, %v173_v58 }
  0x3a   : > { %v242_v39 = vadd.f32 %v241_v29, %v240_v33  ;;  %v439_v6 = vadd.f32 %v438_v61, %v437_v0  ;;  %v450_v33 = vsel %vm203_vm1, %v364_v20, 0.0  ;;  %v273_v61 = vsel %vm203_vm1, %v173_v58, 0.0  ;;  %v174_v0 = vld [vmem:[%s752_s15 + $0x120] sm:$0xff] }
  0x3b   : > { %v377_v34 = vmul.f32 %v174_v0, %v174_v0 }
  0x3c   : > { %v244_v45 = vadd.f32 %v243_v35, %v242_v39  ;;  %v441_v12 = vadd.f32 %v440_v3, %v439_v6  ;;  %v452_v39 = vsel %vm203_vm1, %v365_v26, 0.0  ;;  %v275_v3 = vsel %vm203_vm1, %v174_v0, 0.0  ;;  %v175_v6 = vld [vmem:[%s752_s15 + $0x128] sm:$0xff] }
  0x3d   : > { %v378_v40 = vmul.f32 %v175_v6, %v175_v6 }
  0x3e   : > { %v246_v51 = vadd.f32 %v245_v41, %v244_v45  ;;  %v443_v18 = vadd.f32 %v442_v9, %v441_v12  ;;  %v454_v45 = vsel %vm203_vm1, %v366_v32, 0.0  ;;  %v277_v9 = vsel %vm203_vm1, %v175_v6, 0.0  ;;  %v176_v12 = vld [vmem:[%s752_s15 + $0x130] sm:$0xff] }
  0x3f   : > { %v379_v46 = vmul.f32 %v176_v12, %v176_v12 }
  0x40   : > { %v248_v57 = vadd.f32 %v247_v47, %v246_v51  ;;  %v445_v24 = vadd.f32 %v444_v15, %v443_v18  ;;  %v456_v51 = vsel %vm203_vm1, %v367_v38, 0.0  ;;  %v279_v15 = vsel %vm203_vm1, %v176_v12, 0.0  ;;  %v177_v18 = vld [vmem:[%s752_s15 + $0x138] sm:$0xff] }
  0x41   : > { %v380_v52 = vmul.f32 %v177_v18, %v177_v18 }
  0x42   : > { %v250_v63 = vadd.f32 %v249_v53, %v248_v57  ;;  %v447_v30 = vadd.f32 %v446_v21, %v445_v24  ;;  %v458_v57 = vsel %vm203_vm1, %v368_v44, 0.0  ;;  %v281_v21 = vsel %vm203_vm1, %v177_v18, 0.0  ;;  %v178_v24 = vld [vmem:[%s752_s15 + $0x140] sm:$0xff] }
  0x43   : > { %v381_v58 = vmul.f32 %v178_v24, %v178_v24 }
  0x44   : > { %v252_v5 = vadd.f32 %v251_v59, %v250_v63  ;;  %v449_v36 = vadd.f32 %v448_v27, %v447_v30  ;;  %v460_v63 = vsel %vm203_vm1, %v369_v50, 0.0  ;;  %v283_v27 = vsel %vm203_vm1, %v178_v24, 0.0  ;;  %v179_v30 = vld [vmem:[%s752_s15 + $0x148] sm:$0xff] }
  0x45   : > { %v382_v0 = vmul.f32 %v179_v30, %v179_v30 }
  0x46   : > { %v254_v11 = vadd.f32 %v253_v1, %v252_v5  ;;  %v451_v42 = vadd.f32 %v450_v33, %v449_v36  ;;  %v462_v5 = vsel %vm203_vm1, %v370_v56, 0.0  ;;  %v285_v33 = vsel %vm203_vm1, %v179_v30, 0.0  ;;  %v180_v36 = vld [vmem:[%s752_s15 + $0x150] sm:$0xff] }
  0x47   : > { %v383_v6 = vmul.f32 %v180_v36, %v180_v36 }
  0x48   : > { %v256_v17 = vadd.f32 %v255_v7, %v254_v11  ;;  %v453_v48 = vadd.f32 %v452_v39, %v451_v42  ;;  %v464_v11 = vsel %vm203_vm1, %v371_v62, 0.0  ;;  %v287_v39 = vsel %vm203_vm1, %v180_v36, 0.0  ;;  %v181_v42 = vld [vmem:[%s752_s15 + $0x158] sm:$0xff] }
  0x49   : > { %v384_v12 = vmul.f32 %v181_v42, %v181_v42 }
  0x4a   : > { %v258_v23 = vadd.f32 %v257_v13, %v256_v17  ;;  %v455_v54 = vadd.f32 %v454_v45, %v453_v48  ;;  %v466_v17 = vsel %vm203_vm1, %v372_v4, 0.0  ;;  %v289_v45 = vsel %vm203_vm1, %v181_v42, 0.0  ;;  %v182_v48 = vld [vmem:[%s752_s15 + $0x160] sm:$0xff] }
  0x4b   : > { %v385_v18 = vmul.f32 %v182_v48, %v182_v48 }
  0x4c   : > { %v260_v29 = vadd.f32 %v259_v19, %v258_v23  ;;  %v457_v60 = vadd.f32 %v456_v51, %v455_v54  ;;  %v468_v23 = vsel %vm203_vm1, %v373_v10, 0.0  ;;  %v291_v51 = vsel %vm203_vm1, %v182_v48, 0.0  ;;  %v183_v54 = vld [vmem:[%s752_s15 + $0x168] sm:$0xff] }
  0x4d   : > { %v386_v24 = vmul.f32 %v183_v54, %v183_v54 }
  0x4e   : > { %v262_v35 = vadd.f32 %v261_v25, %v260_v29  ;;  %v459_v2 = vadd.f32 %v458_v57, %v457_v60  ;;  %v470_v29 = vsel %vm203_vm1, %v374_v16, 0.0  ;;  %v293_v57 = vsel %vm203_vm1, %v183_v54, 0.0  ;;  %v184_v60 = vld [vmem:[%s752_s15 + $0x170] sm:$0xff] }
  0x4f   : > { %v387_v30 = vmul.f32 %v184_v60, %v184_v60 }
  0x50   : > { %v264_v41 = vadd.f32 %v263_v31, %v262_v35  ;;  %v461_v8 = vadd.f32 %v460_v63, %v459_v2  ;;  %v472_v35 = vsel %vm203_vm1, %v375_v22, 0.0  ;;  %v295_v63 = vsel %vm203_vm1, %v184_v60, 0.0  ;;  %v185_v2 = vld [vmem:[%s752_s15 + $0x178] sm:$0xff] }
  0x51   : > { %v388_v36 = vmul.f32 %v185_v2, %v185_v2 }
  0x52   : > { %v266_v47 = vadd.f32 %v265_v37, %v264_v41  ;;  %v463_v14 = vadd.f32 %v462_v5, %v461_v8  ;;  %v474_v41 = vsel %vm203_vm1, %v376_v28, 0.0  ;;  %v297_v5 = vsel %vm203_vm1, %v185_v2, 0.0  ;;  %v186_v8 = vld [vmem:[%s752_s15 + $0x180] sm:$0xff] }
  0x53   : > { %v389_v42 = vmul.f32 %v186_v8, %v186_v8 }
  0x54   : > { %v268_v53 = vadd.f32 %v267_v43, %v266_v47  ;;  %v465_v20 = vadd.f32 %v464_v11, %v463_v14  ;;  %v476_v47 = vsel %vm203_vm1, %v377_v34, 0.0  ;;  %v299_v11 = vsel %vm203_vm1, %v186_v8, 0.0  ;;  %v187_v14 = vld [vmem:[%s752_s15 + $0x188] sm:$0xff] }
  0x55   : > { %v390_v48 = vmul.f32 %v187_v14, %v187_v14 }
  0x56   : > { %v270_v59 = vadd.f32 %v269_v49, %v268_v53  ;;  %v467_v26 = vadd.f32 %v466_v17, %v465_v20  ;;  %v478_v53 = vsel %vm203_vm1, %v378_v40, 0.0  ;;  %v301_v17 = vsel %vm203_vm1, %v187_v14, 0.0  ;;  %v188_v20 = vld [vmem:[%s752_s15 + $0x190] sm:$0xff] }
  0x57   : > { %v391_v54 = vmul.f32 %v188_v20, %v188_v20 }
  0x58   : > { %v272_v1 = vadd.f32 %v271_v55, %v270_v59  ;;  %v469_v32 = vadd.f32 %v468_v23, %v467_v26  ;;  %v480_v59 = vsel %vm203_vm1, %v379_v46, 0.0  ;;  %v303_v23 = vsel %vm203_vm1, %v188_v20, 0.0  ;;  %v189_v26 = vld [vmem:[%s752_s15 + $0x198] sm:$0xff] }
  0x59   : > { %v392_v60 = vmul.f32 %v189_v26, %v189_v26 }
  0x5a   : > { %v274_v7 = vadd.f32 %v273_v61, %v272_v1  ;;  %v471_v38 = vadd.f32 %v470_v29, %v469_v32  ;;  %v482_v1 = vsel %vm203_vm1, %v380_v52, 0.0  ;;  %v305_v29 = vsel %vm203_vm1, %v189_v26, 0.0  ;;  %v190_v32 = vld [vmem:[%s752_s15 + $0x1a0] sm:$0xff] }
  0x5b   : > { %v393_v2 = vmul.f32 %v190_v32, %v190_v32 }
  0x5c   : > { %v276_v13 = vadd.f32 %v275_v3, %v274_v7  ;;  %v473_v44 = vadd.f32 %v472_v35, %v471_v38  ;;  %v484_v7 = vsel %vm203_vm1, %v381_v58, 0.0  ;;  %v307_v35 = vsel %vm203_vm1, %v190_v32, 0.0  ;;  %v191_v38 = vld [vmem:[%s752_s15 + $0x1a8] sm:$0xff] }
  0x5d   : > { %v394_v8 = vmul.f32 %v191_v38, %v191_v38 }
  0x5e   : > { %v278_v19 = vadd.f32 %v277_v9, %v276_v13  ;;  %v475_v50 = vadd.f32 %v474_v41, %v473_v44  ;;  %v486_v13 = vsel %vm203_vm1, %v382_v0, 0.0  ;;  %v309_v41 = vsel %vm203_vm1, %v191_v38, 0.0  ;;  %v192_v44 = vld [vmem:[%s752_s15 + $0x1b0] sm:$0xff] }
  0x5f   : > { %v395_v14 = vmul.f32 %v192_v44, %v192_v44 }
  0x60   : > { %v280_v25 = vadd.f32 %v279_v15, %v278_v19  ;;  %v477_v56 = vadd.f32 %v476_v47, %v475_v50  ;;  %v488_v19 = vsel %vm203_vm1, %v383_v6, 0.0  ;;  %v311_v47 = vsel %vm203_vm1, %v192_v44, 0.0  ;;  %v193_v50 = vld [vmem:[%s752_s15 + $0x1b8] sm:$0xff] }
  0x61   : > { %v396_v20 = vmul.f32 %v193_v50, %v193_v50 }
  0x62   : > { %v282_v31 = vadd.f32 %v281_v21, %v280_v25  ;;  %v479_v62 = vadd.f32 %v478_v53, %v477_v56  ;;  %v490_v25 = vsel %vm203_vm1, %v384_v12, 0.0  ;;  %v313_v53 = vsel %vm203_vm1, %v193_v50, 0.0  ;;  %v194_v56 = vld [vmem:[%s752_s15 + $0x1c0] sm:$0xff] }
  0x63   : > { %v397_v26 = vmul.f32 %v194_v56, %v194_v56 }
  0x64   : > { %v284_v37 = vadd.f32 %v283_v27, %v282_v31  ;;  %v481_v4 = vadd.f32 %v480_v59, %v479_v62  ;;  %v492_v31 = vsel %vm203_vm1, %v385_v18, 0.0  ;;  %v315_v59 = vsel %vm203_vm1, %v194_v56, 0.0  ;;  %v195_v62 = vld [vmem:[%s752_s15 + $0x1c8] sm:$0xff] }
  0x65   : > { %v398_v32 = vmul.f32 %v195_v62, %v195_v62 }
  0x66   : > { %v286_v43 = vadd.f32 %v285_v33, %v284_v37  ;;  %v483_v10 = vadd.f32 %v482_v1, %v481_v4  ;;  %v494_v37 = vsel %vm203_vm1, %v386_v24, 0.0  ;;  %v317_v1 = vsel %vm203_vm1, %v195_v62, 0.0  ;;  %v196_v4 = vld [vmem:[%s752_s15 + $0x1d0] sm:$0xff] }
  0x67   : > { %v399_v38 = vmul.f32 %v196_v4, %v196_v4 }
  0x68   : > { %v288_v49 = vadd.f32 %v287_v39, %v286_v43  ;;  %v485_v16 = vadd.f32 %v484_v7, %v483_v10  ;;  %v496_v43 = vsel %vm203_vm1, %v387_v30, 0.0  ;;  %v319_v7 = vsel %vm203_vm1, %v196_v4, 0.0  ;;  %v197_v10 = vld [vmem:[%s752_s15 + $0x1d8] sm:$0xff] }
  0x6a   : > { %v290_v55 = vadd.f32 %v289_v45, %v288_v49  ;;  %v487_v22 = vadd.f32 %v486_v13, %v485_v16  ;;  %v498_v49 = vsel %vm203_vm1, %v388_v36, 0.0  ;;  %v321_v13 = vsel %vm203_vm1, %v197_v10, 0.0  ;;  %v198_v16 = vld [vmem:[%s752_s15 + $0x1e0] sm:$0xff] }
  0x6c   : > { %v292_v61 = vadd.f32 %v291_v51, %v290_v55  ;;  %v489_v28 = vadd.f32 %v488_v19, %v487_v22  ;;  %v500_v55 = vsel %vm203_vm1, %v389_v42, 0.0  ;;  %v323_v19 = vsel %vm203_vm1, %v198_v16, 0.0  ;;  %v199_v22 = vld [vmem:[%s752_s15 + $0x1e8] sm:$0xff] }
  0x6d   : > { %v400_v42 = vmul.f32 %v197_v10, %v197_v10  ;;  %v402_v50 = vmul.f32 %v199_v22, %v199_v22 }
  0x6e   : > { %v294_v3 = vadd.f32 %v293_v57, %v292_v61  ;;  %v491_v34 = vadd.f32 %v490_v25, %v489_v28  ;;  %v502_v61 = vsel %vm203_vm1, %v390_v48, 0.0  ;;  %v325_v25 = vsel %vm203_vm1, %v199_v22, 0.0  ;;  %v200_v28 = vld [vmem:[%s752_s15 + $0x1f0] sm:$0xff] }
  0x70   : > { %v296_v9 = vadd.f32 %v295_v63, %v294_v3  ;;  %v493_v40 = vadd.f32 %v492_v31, %v491_v34  ;;  %v504_v3 = vsel %vm203_vm1, %v391_v54, 0.0  ;;  %v327_v31 = vsel %vm203_vm1, %v200_v28, 0.0  ;;  %v201_v34 = vld [vmem:[%s752_s15 + $0x1f8] sm:$0xff] }
  0x71   : > { %v403_v54 = vmul.f32 %v200_v28, %v200_v28 }
  0x72   : > { %v298_v15 = vadd.f32 %v297_v5, %v296_v9  ;;  %v495_v46 = vadd.f32 %v494_v37, %v493_v40  ;;  %v506_v9 = vsel %vm203_vm1, %v392_v60, 0.0  ;;  %v329_v37 = vsel %vm203_vm1, %v201_v34, 0.0 }
  0x73   : > { %v528_v62 = vsel %vm203_vm1, %v403_v54, 0.0 }
  0x74   : > { %v300_v21 = vadd.f32 %v299_v11, %v298_v15  ;;  %v497_v52 = vadd.f32 %v496_v43, %v495_v46  ;;  %v508_v15 = vsel %vm203_vm1, %v393_v2, 0.0  ;;  %v518_v43 = vsel %vm203_vm1, %v398_v32, 0.0 }
  0x75   : > { %v401_v46 = vmul.f32 %v198_v16, %v198_v16 }
  0x76   : > { %v302_v27 = vadd.f32 %v301_v17, %v300_v21  ;;  %v499_v58 = vadd.f32 %v498_v49, %v497_v52  ;;  %v510_v21 = vsel %vm203_vm1, %v394_v8, 0.0 }
  0x78   : > { %v304_v33 = vadd.f32 %v303_v23, %v302_v27  ;;  %v501_v0 = vadd.f32 %v500_v55, %v499_v58  ;;  %v512_v27 = vsel %vm203_vm1, %v395_v14, 0.0  ;;  %v524_v55 = vsel %vm203_vm1, %v401_v46, 0.0 }
  0x79   : > { %v404_v58 = vmul.f32 %v201_v34, %v201_v34 }
  0x7a   : > { %v306_v39 = vadd.f32 %v305_v29, %v304_v33  ;;  %v503_v6 = vadd.f32 %v502_v61, %v501_v0  ;;  %v514_v33 = vsel %vm203_vm1, %v396_v20, 0.0 }
  0x7b   : > { %v530_v2 = vsel %vm203_vm1, %v404_v58, 0.0 }
  0x7c   : > { %v308_v45 = vadd.f32 %v307_v35, %v306_v39  ;;  %v505_v12 = vadd.f32 %v504_v3, %v503_v6  ;;  %v516_v39 = vsel %vm203_vm1, %v397_v26, 0.0 }
  0x7e   : > { %v310_v51 = vadd.f32 %v309_v41, %v308_v45  ;;  %v507_v18 = vadd.f32 %v506_v9, %v505_v12  ;;  %v340_v12 = vld [vmem:[#allocation4] sm:$0x1] }
  0x80   : > { %v312_v57 = vadd.f32 %v311_v47, %v310_v51  ;;  %v509_v24 = vadd.f32 %v508_v15, %v507_v18  ;;  %v520_v47 = vsel %vm203_vm1, %v399_v38, 0.0  ;;  %v522_v51 = vsel %vm203_vm1, %v400_v42, 0.0 }
  0x82   : > { %v314_v63 = vadd.f32 %v313_v53, %v312_v57  ;;  %v511_v30 = vadd.f32 %v510_v21, %v509_v24 }
  0x84   : > { %v316_v5 = vadd.f32 %v315_v59, %v314_v63  ;;  %v513_v36 = vadd.f32 %v512_v27, %v511_v30  ;;  %v526_v59 = vsel %vm203_vm1, %v402_v50, 0.0 }
  0x86   : > { %v318_v11 = vadd.f32 %v317_v1, %v316_v5  ;;  %v515_v41 = vadd.f32 %v514_v33, %v513_v36  ;;  %v202_v1 = vld [vmem:[#allocation2] sm:$0x1] }
  0x88   : > { %v320_v17 = vadd.f32 %v319_v7, %v318_v11  ;;  %v517_v45 = vadd.f32 %v516_v39, %v515_v41 }
  0x8a   : > { %v322_v23 = vadd.f32 %v321_v13, %v320_v17  ;;  %v519_v49 = vadd.f32 %v518_v43, %v517_v45 }
  0x8c   : > { %v324_v29 = vadd.f32 %v323_v19, %v322_v23  ;;  %v521_v53 = vadd.f32 %v520_v47, %v519_v49 }
  0x8e   : > { %v326_v35 = vadd.f32 %v325_v25, %v324_v29  ;;  %v523_v57 = vadd.f32 %v522_v51, %v521_v53 }
  0x90   : > { %v328_v40 = vadd.f32 %v327_v31, %v326_v35  ;;  %v525_v61 = vadd.f32 %v524_v55, %v523_v57 }
  0x92   : > { %v330_v44 = vadd.f32 %v329_v37, %v328_v40  ;;  %v527_v0 = vadd.f32 %v526_v59, %v525_v61 }
  0x94   : > { %v331_v48 = vrot.slane %v330_v44, 4  ;;  %v529_v4 = vadd.f32 %v528_v62, %v527_v0 }
  0x96   : > { %v332_v52 = vadd.f32 %v331_v48, %v330_v44  ;;  %v531_v6 = vadd.f32 %v530_v2, %v529_v4 }
  0x98   : > { %v333_v56 = vrot.slane %v332_v52, 2  ;;  %v532_v7 = vrot.slane %v531_v6, 4 }
  0x9a   : > { %v334_v60 = vadd.f32 %v333_v56, %v332_v52  ;;  %v533_v8 = vadd.f32 %v532_v7, %v531_v6 }
  0x9c   : > { %v335_v63 = vrot.slane %v334_v60, 1  ;;  %v534_v9 = vrot.slane %v533_v8, 2 }
  0x9e   : > { %v336_v3 = vadd.f32 %v335_v63, %v334_v60  ;;  %v535_v10 = vadd.f32 %v534_v9, %v533_v8 }
  0xa0   : > { %v337_v5 = vadd.f32 %v336_v3, %v202_v1  ;;  %v536_v11 = vrot.slane %v535_v10, 1 }
  0xa2   : > { %339 = vst.msk [vmem:[#allocation2] sm:$0x1] %vm338_vm2, %v337_v5  ;;  %v537_v13 = vadd.f32 %v536_v11, %v535_v10 }
  0xa3   : > { %626 = dma.vmem_to_hbm [thread:$0]  (%p633_p5), %s547_s17, 16, %s549_s20, [#allocation3]  }
  0xa4   : > { %v538_v14 = vadd.f32 %v537_v13, %v340_v12 }
  0xa6   : > { %539 = vst.msk [vmem:[#allocation4] sm:$0x1] %vm338_vm2, %v538_v14 }
  0xa7   : > { %628 = dma.vmem_to_hbm [thread:$0]  (%p633_p5), %s559_s22, 16, %s561_s25, [#allocation5]  }
  0xa8   : > { %709 = dma.done.wait (%p633_p5), [#allocation3], 16  }
  0xa9   : > { %711 = vsyncadd (%p633_p5), [#allocation3], 4294967280 }
  0xaa   : > { %713 = dma.done.wait (%p633_p5), [#allocation5], 16  }
  0xab   : > { %715 = vsyncadd (%p633_p5), [#allocation5], 4294967280 }
  0xac PF: > { %s15_s9 = sadd.s32 1, %s718_s9  }
  0xad   : > { %p12_p6 = scmp.ge.s32.totalorder %s15_s9, 18  }
  0xaf   :  { %14 = sbr.rel (!%p12_p6) target bundleno = 2 (0x2), region = 63 }
  0xb4   :  { %579 = vsyncpa [#allocation3], 1 }
  0xb5   :  { %581 = vsyncpa [#allocation3 + $0x1], 1 }
  0xb6   :  { %582 = vsyncpa [#allocation5], 1 }

</bundles_post_ra>
